<compile_context>
chip_gen: v6e
topology: v6e:2x2x1
jax: 0.10.0
libtpu: 0.0.40
codegen_flags: <defaults>
</compile_context>

<pallas_src>
import functools

import jax
import jax.numpy as jnp
from jax.experimental import pallas as pl
from jax.experimental.pallas import tpu as pltpu


def _round_up(x, m):
    return ((x + m - 1) // m) * m


def _policy_fwd_kernel(x_ref, w1_ref, b1_ref, w2_ref, b2_ref, wh_ref, bh_ref,
                       out_ref, *, action_dim):
    """One batch tile of the full forward pass (3 MXU stages + elementwise).

    out_ref is a lane-padded (tile, 128) slab:
      lanes [0, A)   -> mean
      lanes [A, 2A)  -> std = exp(clamp(log_std, -20, 2))
      lanes >= 2A    -> padding (discarded by the wrapper)
    """
    cdt = w1_ref.dtype                       # MXU input dtype (f32 or bf16)
    x = x_ref[...].astype(cdt)

    h1 = jnp.dot(x, w1_ref[...], preferred_element_type=jnp.float32)
    h1 = jnp.maximum(h1 + b1_ref[...], 0.0)                     # f32 elementwise

    h2 = jnp.dot(h1.astype(cdt), w2_ref[...], preferred_element_type=jnp.float32)
    h2 = jnp.maximum(h2 + b2_ref[...], 0.0)                     # f32 elementwise

    # Fused, lane-padded head: one (tile, 256) x (256, 128) matmul.
    head = jnp.dot(h2.astype(cdt), wh_ref[...], preferred_element_type=jnp.float32)
    head = head + bh_ref[...]                                   # (tile, 128) f32

    # Per-lane select: first A lanes keep the raw mean, the rest take
    # exp(clamp(., -20, 2)).  exp is EUP work (free slot); the select keeps
    # the store lane-dense (single unmasked vst path).
    lane = jax.lax.broadcasted_iota(jnp.int32, head.shape, 1)
    std_lanes = jnp.exp(jnp.clip(head, -20.0, 2.0))
    out_ref[...] = jnp.where(lane < action_dim, head, std_lanes)


def policy_forward(state, params, *, b_tile=256):
    """state: (B, state_dim) f32. params: dict from init_params (fused head)."""
    B, S = state.shape
    w1, b1 = params["w1_t"], params["b1"]
    w2, b2 = params["w2_t"], params["b2"]
    wh, bh = params["wh_t"], params["bh"]
    A = params["action_dim"]
    H = w1.shape[1]
    HP = wh.shape[1]                                   # lane-padded head width (128)

    # Batch tiling: tile is a multiple of 8 sublanes; pad B up to a tile multiple.
    tile = _round_up(max(8, min(b_tile, _round_up(B, 8))), 8)
    B_pad = _round_up(B, tile)
    if B_pad != B:
        state = jnp.pad(state, ((0, B_pad - B), (0, 0)))

    grid = (B_pad // tile,)

    # Weights/biases: index_map returns the same block every step -> they are
    # DMA'd once and stay VMEM-resident while x / out tiles pipeline.
    in_specs = [
        pl.BlockSpec((tile, S), lambda i: (i, 0)),      # x: one tile per step
        pl.BlockSpec((S, H),   lambda i: (0, 0)),       # w1 (resident)
        pl.BlockSpec((1, H),   lambda i: (0, 0)),       # b1
        pl.BlockSpec((H, H),   lambda i: (0, 0)),       # w2 (resident)
        pl.BlockSpec((1, H),   lambda i: (0, 0)),       # b2
        pl.BlockSpec((H, HP),  lambda i: (0, 0)),       # fused head weight (resident)
        pl.BlockSpec((1, HP),  lambda i: (0, 0)),       # fused head bias
    ]
    out_spec = pl.BlockSpec((tile, HP), lambda i: (i, 0))

    args = (state, w1, b1, w2, b2, wh, bh)

    flops = 2 * B_pad * (S * H + H * H + H * HP)
    bytes_accessed = sum(int(a.size) * a.dtype.itemsize for a in args) \
        + B_pad * HP * 4
    cost = pl.CostEstimate(flops=flops,
                           transcendentals=B_pad * HP,
                           bytes_accessed=bytes_accessed)

    out = pl.pallas_call(
        functools.partial(_policy_fwd_kernel, action_dim=A),
        out_shape=jax.ShapeDtypeStruct((B_pad, HP), jnp.float32),
        grid=grid,
        in_specs=in_specs,
        out_specs=out_spec,
        compiler_params=pltpu.CompilerParams(
            dimension_semantics=("parallel",)),          # v7x: 2 TCs split the batch
        cost_estimate=cost,
    )(*args)

    mean = out[:B, :A]
    std = out[:B, A:2 * A]
    return mean, std


def init_params(key, state_dim, action_dim, hidden=256, init_weight=0.01,
                param_dtype=jnp.float32):
    """Matches the PyTorch module's init: weights ~ U(-w, w), biases ~ U(0, w).

    Weights are stored pre-transposed (in, out).  The mean / log_std head
    weights are fused and zero-padded to a lane-dense (hidden, 128) slab.
    Weights may be stored in bf16 (param_dtype); biases stay f32 so the
    elementwise path runs in f32 on all chips.
    """
    ks = jax.random.split(key, 8)

    def w(k, shape):
        return jax.random.uniform(k, shape, jnp.float32, -init_weight, init_weight)

    def b(k, n):
        return jax.random.uniform(k, (1, n), jnp.float32, 0.0, init_weight)

    wm_t = w(ks[4], (hidden, action_dim))
    bm = b(ks[5], action_dim)
    ws_t = w(ks[6], (hidden, action_dim))
    bs = b(ks[7], action_dim)

    head_pad = max(128, _round_up(2 * action_dim, 128))
    wh_t = jnp.zeros((hidden, head_pad), jnp.float32)
    wh_t = wh_t.at[:, :action_dim].set(wm_t)
    wh_t = wh_t.at[:, action_dim:2 * action_dim].set(ws_t)
    bh = jnp.zeros((1, head_pad), jnp.float32)
    bh = bh.at[:, :action_dim].set(bm)
    bh = bh.at[:, action_dim:2 * action_dim].set(bs)

    return {
        "w1_t": w(ks[0], (state_dim, hidden)).astype(param_dtype),
        "b1": b(ks[1], hidden),
        "w2_t": w(ks[2], (hidden, hidden)).astype(param_dtype),
        "b2": b(ks[3], hidden),
        "wh_t": wh_t.astype(param_dtype),
        "bh": bh,
        "action_dim": action_dim,
    }


def policy_forward_ref(state, p):
    """Pure-JAX f32 reference (same fused/padded weights, f32 math)."""
    w1 = p["w1_t"].astype(jnp.float32)
    w2 = p["w2_t"].astype(jnp.float32)
    wh = p["wh_t"].astype(jnp.float32)
    A = p["action_dim"]
    h1 = jnp.maximum(state @ w1 + p["b1"], 0.0)
    h2 = jnp.maximum(h1 @ w2 + p["b2"], 0.0)
    head = h2 @ wh + p["bh"]
    mean = head[:, :A]
    log_std = jnp.clip(head[:, A:2 * A], -20.0, 2.0)
    return mean, jnp.exp(log_std)


if __name__ == "__main__":
    key = jax.random.PRNGKey(0)
    k_param, k_state = jax.random.split(key)

    state_dim, action_dim = 32, 8

    # --- Test 1: small batch, f32 weights (single grid step) -----------------
    params = init_params(k_param, state_dim, action_dim)
    state_small = jax.random.normal(k_state, (4, state_dim), jnp.float32)

    mean, std = policy_forward(state_small, params)
    jax.block_until_ready((mean, std))
    mean_r, std_r = policy_forward_ref(state_small, params)
    assert mean.shape == (4, action_dim) and std.shape == (4, action_dim)
    assert jnp.allclose(mean, mean_r, atol=1e-5, rtol=1e-5)
    assert jnp.allclose(std, std_r, atol=1e-5, rtol=1e-5)

    # --- Test 2: batched grid (2 tiles of 128 rows), f32 weights -------------
    state_big = jax.random.normal(k_state, (256, state_dim), jnp.float32)
    mean, std = policy_forward(state_big, params, b_tile=128)
    jax.block_until_ready((mean, std))
    mean_r, std_r = policy_forward_ref(state_big, params)
    assert mean.shape == (256, action_dim) and std.shape == (256, action_dim)
    assert jnp.allclose(mean, mean_r, atol=1e-5, rtol=1e-5)
    assert jnp.allclose(std, std_r, atol=1e-5, rtol=1e-5)

    # --- Test 3: bf16 weight storage (v6e/v7x path), f32 accumulation --------
    params_bf16 = init_params(k_param, state_dim, action_dim,
                              param_dtype=jnp.bfloat16)
    mean_b, std_b = policy_forward(state_big, params_bf16, b_tile=128)
    jax.block_until_ready((mean_b, std_b))
    mean_br, std_br = policy_forward_ref(state_big, params_bf16)
    assert jnp.all(jnp.isfinite(mean_b)) and jnp.all(jnp.isfinite(std_b))
    assert jnp.allclose(mean_b, mean_br, atol=2e-2, rtol=2e-2)
    assert jnp.allclose(std_b, std_br, atol=2e-2, rtol=2e-2)

    print("KERNEL_OK")
</pallas_src>

<mosaic_0001>
module attributes {stable_mosaic.version = 11 : i64} {
  func.func @_policy_fwd_kernel(%arg0: i32, %arg1: memref<8x32xf32, #tpu.memory_space<vmem>>, %arg2: memref<32x256xf32, #tpu.memory_space<vmem>>, %arg3: memref<1x256xf32, #tpu.memory_space<vmem>>, %arg4: memref<256x256xf32, #tpu.memory_space<vmem>>, %arg5: memref<1x256xf32, #tpu.memory_space<vmem>>, %arg6: memref<256x128xf32, #tpu.memory_space<vmem>>, %arg7: memref<1x128xf32, #tpu.memory_space<vmem>>, %arg8: memref<8x128xf32, #tpu.memory_space<vmem>>) attributes {dimension_semantics = [#tpu.dimension_semantics<parallel>], iteration_bounds = array<i64: 1>, scalar_prefetch = 0 : i64, scratch_operands = 0 : i64, tpu.core_type = #tpu.core_type<tc>, window_params = [{transform_indices = @transform_0, window_bounds = array<i64: 8, 32>}, {pipeline_mode = #tpu.pipeline_mode<synchronous>, transform_indices = @transform_1, window_bounds = array<i64: 32, 256>}, {pipeline_mode = #tpu.pipeline_mode<synchronous>, transform_indices = @transform_2, window_bounds = array<i64: 1, 256>}, {pipeline_mode = #tpu.pipeline_mode<synchronous>, transform_indices = @transform_3, window_bounds = array<i64: 256, 256>}, {pipeline_mode = #tpu.pipeline_mode<synchronous>, transform_indices = @transform_4, window_bounds = array<i64: 1, 256>}, {pipeline_mode = #tpu.pipeline_mode<synchronous>, transform_indices = @transform_5, window_bounds = array<i64: 256, 128>}, {pipeline_mode = #tpu.pipeline_mode<synchronous>, transform_indices = @transform_6, window_bounds = array<i64: 1, 128>}, {transform_indices = @transform_7, window_bounds = array<i64: 8, 128>}]} {
    %c0 = arith.constant 0 : index
    %c0_0 = arith.constant 0 : index
    %0 = vector.load %arg1[%c0, %c0_0] : memref<8x32xf32, #tpu.memory_space<vmem>>, vector<8x32xf32>
    %c0_1 = arith.constant 0 : index
    %c0_2 = arith.constant 0 : index
    %1 = vector.load %arg2[%c0_1, %c0_2] : memref<32x256xf32, #tpu.memory_space<vmem>>, vector<32x256xf32>
    %cst = arith.constant dense<0.000000e+00> : vector<8x256xf32>
    %2 = tpu.matmul %0, %1, %cst {dimension_numbers = #tpu.dot_dimension_numbers<[1], [0], [0], [1], [0, 0, 1, 1], [], []>} : vector<8x32xf32>, vector<32x256xf32>, vector<8x256xf32> -> vector<8x256xf32>
    %c0_3 = arith.constant 0 : index
    %c0_4 = arith.constant 0 : index
    %3 = vector.load %arg3[%c0_3, %c0_4] : memref<1x256xf32, #tpu.memory_space<vmem>>, vector<1x256xf32>
    %4 = vector.broadcast %3 : vector<1x256xf32> to vector<8x256xf32>
    %5 = arith.addf %2, %4 : vector<8x256xf32>
    %cst_5 = arith.constant 0.000000e+00 : f32
    %6 = vector.broadcast %cst_5 : f32 to vector<8x256xf32>
    %7 = arith.maximumf %5, %6 : vector<8x256xf32>
    %c0_6 = arith.constant 0 : index
    %c0_7 = arith.constant 0 : index
    %8 = vector.load %arg4[%c0_6, %c0_7] : memref<256x256xf32, #tpu.memory_space<vmem>>, vector<256x256xf32>
    %cst_8 = arith.constant dense<0.000000e+00> : vector<8x256xf32>
    %9 = tpu.matmul %7, %8, %cst_8 {dimension_numbers = #tpu.dot_dimension_numbers<[1], [0], [0], [1], [0, 0, 1, 1], [], []>} : vector<8x256xf32>, vector<256x256xf32>, vector<8x256xf32> -> vector<8x256xf32>
    %c0_9 = arith.constant 0 : index
    %c0_10 = arith.constant 0 : index
    %10 = vector.load %arg5[%c0_9, %c0_10] : memref<1x256xf32, #tpu.memory_space<vmem>>, vector<1x256xf32>
    %11 = vector.broadcast %10 : vector<1x256xf32> to vector<8x256xf32>
    %12 = arith.addf %9, %11 : vector<8x256xf32>
    %cst_11 = arith.constant 0.000000e+00 : f32
    %13 = vector.broadcast %cst_11 : f32 to vector<8x256xf32>
    %14 = arith.maximumf %12, %13 : vector<8x256xf32>
    %c0_12 = arith.constant 0 : index
    %c0_13 = arith.constant 0 : index
    %15 = vector.load %arg6[%c0_12, %c0_13] : memref<256x128xf32, #tpu.memory_space<vmem>>, vector<256x128xf32>
    %cst_14 = arith.constant dense<0.000000e+00> : vector<8x128xf32>
    %16 = tpu.matmul %14, %15, %cst_14 {dimension_numbers = #tpu.dot_dimension_numbers<[1], [0], [0], [1], [0, 0, 1, 1], [], []>} : vector<8x256xf32>, vector<256x128xf32>, vector<8x128xf32> -> vector<8x128xf32>
    %c0_15 = arith.constant 0 : index
    %c0_16 = arith.constant 0 : index
    %17 = vector.load %arg7[%c0_15, %c0_16] : memref<1x128xf32, #tpu.memory_space<vmem>>, vector<1x128xf32>
    %18 = vector.broadcast %17 : vector<1x128xf32> to vector<8x128xf32>
    %19 = arith.addf %16, %18 : vector<8x128xf32>
    %20 = tpu.iota {dimensions = array<i32: 1>} : vector<8x128xi32>
    %cst_17 = arith.constant -2.000000e+01 : f32
    %cst_18 = arith.constant 2.000000e+00 : f32
    %21 = vector.broadcast %cst_17 : f32 to vector<8x128xf32>
    %22 = arith.maximumf %21, %19 : vector<8x128xf32>
    %23 = vector.broadcast %cst_18 : f32 to vector<8x128xf32>
    %24 = arith.minimumf %23, %22 : vector<8x128xf32>
    %25 = math.exp %24 : vector<8x128xf32>
    %c8_i32 = arith.constant 8 : i32
    %26 = vector.broadcast %c8_i32 : i32 to vector<8x128xi32>
    %27 = arith.cmpi slt, %20, %26 : vector<8x128xi32>
    %28 = arith.select %27, %19, %25 : vector<8x128xi1>, vector<8x128xf32>
    %c0_19 = arith.constant 0 : index
    %c0_20 = arith.constant 0 : index
    %29 = vector.load %arg8[%c0_19, %c0_20] : memref<8x128xf32, #tpu.memory_space<vmem>>, vector<8x128xf32>
    tpu.vector_store %arg8[%c0_19, %c0_20], %28 {strides = array<i32>} : memref<8x128xf32, #tpu.memory_space<vmem>>, vector<8x128xf32>,
    return
  }
  func.func @transform_0(%arg0: i32) -> (i32, i32) {
    %c0_i32 = arith.constant 0 : i32
    %c0_i32_0 = arith.constant 0 : i32
    return %arg0, %c0_i32 : i32, i32
  }
  func.func @transform_1(%arg0: i32) -> (i32, i32) {
    %c0_i32 = arith.constant 0 : i32
    %c0_i32_0 = arith.constant 0 : i32
    %c0_i32_1 = arith.constant 0 : i32
    return %c0_i32, %c0_i32_0 : i32, i32
  }
  func.func @transform_2(%arg0: i32) -> (i32, i32) {
    %c0_i32 = arith.constant 0 : i32
    %c0_i32_0 = arith.constant 0 : i32
    %c0_i32_1 = arith.constant 0 : i32
    return %c0_i32, %c0_i32_0 : i32, i32
  }
  func.func @transform_3(%arg0: i32) -> (i32, i32) {
    %c0_i32 = arith.constant 0 : i32
    %c0_i32_0 = arith.constant 0 : i32
    %c0_i32_1 = arith.constant 0 : i32
    return %c0_i32, %c0_i32_0 : i32, i32
  }
  func.func @transform_4(%arg0: i32) -> (i32, i32) {
    %c0_i32 = arith.constant 0 : i32
    %c0_i32_0 = arith.constant 0 : i32
    %c0_i32_1 = arith.constant 0 : i32
    return %c0_i32, %c0_i32_0 : i32, i32
  }
  func.func @transform_5(%arg0: i32) -> (i32, i32) {
    %c0_i32 = arith.constant 0 : i32
    %c0_i32_0 = arith.constant 0 : i32
    %c0_i32_1 = arith.constant 0 : i32
    return %c0_i32, %c0_i32_0 : i32, i32
  }
  func.func @transform_6(%arg0: i32) -> (i32, i32) {
    %c0_i32 = arith.constant 0 : i32
    %c0_i32_0 = arith.constant 0 : i32
    %c0_i32_1 = arith.constant 0 : i32
    return %c0_i32, %c0_i32_0 : i32, i32
  }
  func.func @transform_7(%arg0: i32) -> (i32, i32) {
    %c0_i32 = arith.constant 0 : i32
    %c0_i32_0 = arith.constant 0 : i32
    return %arg0, %c0_i32 : i32, i32
  }
}

</mosaic_0001>

<bundles_post_ra>
// kernel: tpu_custom_call.1
= control target key start
LH: loop header
LB: loop body
LE: loop exit
PB: predicated region body
PF: predicated region fallthrough
CT: control target
= control target key end

     0   :  { %12 = vsyncpa [#allocation3], 0  ;;  %s693_s0 = inlined_call_operand.hbm [shape: f32[8,32], index: 0, kind: input, shape index: {}]   ;;  %s694_s1 = inlined_call_operand.hbm [shape: f32[32,256], index: 1, kind: input, shape index: {}]   ;;  %s695_s2 = inlined_call_operand.vmem [shape: f32[1,256], index: 2, kind: input, shape index: {}]   ;;  %s696_s3 = inlined_call_operand.hbm [shape: f32[256,256], index: 3, kind: input, shape index: {}]   ;;  %s697_s4 = inlined_call_operand.vmem [shape: f32[1,256], index: 4, kind: input, shape index: {}]   ;;  %s698_s5 = inlined_call_operand.hbm [shape: f32[256,128], index: 5, kind: input, shape index: {}]   ;;  %s699_s6 = inlined_call_operand.vmem [shape: f32[1,128], index: 6, kind: input, shape index: {}]   ;;  %s700_s7 = inlined_call_operand.hbm [shape: f32[8,128], index: 7, kind: output, shape index: {}]  }
   0x1   :  { %13 = vsyncpa [#allocation6], 0 }
   0x2   :  { %14 = vsyncpa [#allocation9], 0 }
   0x3   :  { %15 = vsyncpa [#allocation4], 0  ;;  %s619_s24 = smov [#allocation5]  }
   0x4   :  { %s31_s25 = sshll.u32 %s619_s24, 4  ;;  %s32_s25 = int_to_ptr.vmem [resolvable:$true] %s31_s25 }
   0x5   :  { %s519_s26 = scalar_lea.vmem %s32_s25, 1024  ;;  %p524_p1 = scmp.lt.s32.totalorder %s32_s25, %s32_s25 }
   0x6   :  { %p520_p0 = scmp.ne.s32.totalorder %s32_s25, %s519_s26  ;;  %p525_p2 = scmp.lt.s32.totalorder %s519_s26, %s519_s26 }
   0x8   :  { %p526_p3 = por %p525_p2, %p524_p1 }
   0xa   :  { %p527_p4 = pnand %p526_p3, %p520_p0 }
   0xc   :  { %530 = shalt.err (!%p527_p4)
}
   0xd   :  { %s620_s27 = smov 256   ;;  %s621_s28 = smov 16  }
   0xe   :  { %37 = dma.hbm_to_vmem [thread:$0]  %s694_s1, 1024, %s32_s25, [#allocation6], %s620_s27, %s620_s27, %s621_s28  }
   0xf   :  { %s622_s8 = smov [#allocation2]   ;;  %s623_s10 = smov [#allocation7]  }
  0x10   :  { %s22_s9 = sshll.u32 %s622_s8, 4  ;;  %s45_s11 = sshll.u32 %s623_s10, 4  ;;  %s23_s9 = int_to_ptr.vmem [resolvable:$true] %s22_s9  ;;  %s46_s11 = int_to_ptr.vmem [resolvable:$true] %s45_s11 }
  0x11   :  { %s539_s12 = scalar_lea.vmem %s23_s9, 128  ;;  %p544_p6 = scmp.lt.s32.totalorder %s23_s9, %s23_s9 }
  0x12   :  { %p540_p5 = scmp.ne.s32.totalorder %s23_s9, %s539_s12  ;;  %p545_p7 = scmp.lt.s32.totalorder %s539_s12, %s539_s12 }
  0x14   :  { %p546_p8 = por %p545_p7, %p544_p6 }
  0x16   :  { %p547_p9 = pnand %p546_p8, %p540_p5 }
  0x18   :  { %550 = shalt.err (!%p547_p9)
}
  0x19   :  { %25 = dma.hbm_to_vmem [thread:$0]  %s693_s0, 128, %s23_s9, [#allocation3]  }
  0x1a   :  { %s559_s15 = scalar_lea.vmem %s46_s11, 8192  ;;  %p564_p11 = scmp.lt.s32.totalorder %s46_s11, %s46_s11 }
  0x1b   :  { %p560_p10 = scmp.ne.s32.totalorder %s46_s11, %s559_s15  ;;  %p565_p12 = scmp.lt.s32.totalorder %s559_s15, %s559_s15 }
  0x1d   :  { %p566_p13 = por %p565_p12, %p564_p11 }
  0x1f   :  { %p567_p0 = pnand %p566_p13, %p560_p10 }
  0x21   :  { %570 = shalt.err (!%p567_p0)
}
  0x22   :  { %51 = dma.hbm_to_vmem [thread:$0]  %s696_s3, 8192, %s46_s11, [#allocation6], %s620_s27, %s620_s27, %s621_s28  }
  0x23   :  { %s624_s17 = smov [#allocation8]  }
  0x24   :  { %s59_s18 = sshll.u32 %s624_s17, 4  ;;  %s60_s18 = int_to_ptr.vmem [resolvable:$true] %s59_s18 }
  0x25   :  { %s579_s19 = scalar_lea.vmem %s60_s18, 4096  ;;  %p584_p2 = scmp.lt.s32.totalorder %s60_s18, %s60_s18 }
  0x26   :  { %p580_p1 = scmp.ne.s32.totalorder %s60_s18, %s579_s19  ;;  %p585_p3 = scmp.lt.s32.totalorder %s579_s19, %s579_s19 }
  0x28   :  { %p586_p4 = por %p585_p3, %p584_p2 }
  0x2a   :  { %p587_p5 = pnand %p586_p4, %p580_p1 }
  0x2c   :  { %590 = shalt.err (!%p587_p5)
}
  0x2d   :  { %s625_s0 = smov 128   ;;  %s626_s20 = smov 8  }
  0x2e   :  { %65 = dma.hbm_to_vmem [thread:$0]  %s698_s5, 4096, %s60_s18, [#allocation9], %s625_s0, %s625_s0, %s626_s20  }
  0x2f   :  { %611 = dma.done.wait [#allocation3], 128  }
  0x30   :  { %612 = vsyncadd [#allocation3], 4294967168 }
  0x31   :  { %613 = dma.done.wait [#allocation6], 9216  }
  0x32   :  { %614 = vsyncadd [#allocation6], 4294958080 }
  0x33   :  { %615 = dma.done.wait [#allocation9], 4096  }
  0x34   :  { %616 = vsyncadd [#allocation9], 4294963200  ;;  %v627_v0 = vmov 0.0   ;;  %v88_v1 = vld [vmem:[#allocation5 + $0x38] sm:$0xff]  ;;  %v87_v2 = vld [vmem:[#allocation5 + $0x30] sm:$0xff]  ;;  %vm101_vm0 = vcmask 261120  }
  0x35   :  { %169 = vmatprep.mubr.f32.mxu0 %v627_v0  ;;  %v86_v3 = vld [vmem:[#allocation5 + $0x28] sm:$0xff]  ;;  %129 = vmatprep.subr.mxu0 %v88_v1  ;;  %v85_v4 = vld [vmem:[#allocation5 + $0x20] sm:$0xff]  ;;  %v84_v5 = vld [vmem:[#allocation5 + $0x18] sm:$0xff] }
  0x36   :  { %130 = vmatpush1.msra.mxu0 %v87_v2  ;;  %v83_v6 = vld [vmem:[#allocation5 + $0x10] sm:$0xff]  ;;  %v209_v7 = vld [vmem:[#allocation7 + $0xf8] sm:$0xff]  ;;  %v207_v9 = vld [vmem:[#allocation7 + $0xe8] sm:$0xff] }
  0x37   :  { %131 = vmatprep.subr.mxu0 %v86_v3  ;;  %v208_v8 = vld [vmem:[#allocation7 + $0xf0] sm:$0xff]  ;;  %v82_v10 = vld [vmem:[#allocation5 + $0x8] sm:$0xff]  ;;  %254 = vmatprep.subr.mxu1 %v209_v7  ;;  %v206_v11 = vld [vmem:[#allocation7 + $0xe0] sm:$0xff] }
  0x38   :  { %132 = vmatpush1.msra.mxu0 %v85_v4  ;;  %v81_v12 = vld [vmem:[#allocation5] sm:$0xff]  ;;  %255 = vmatpush1.msra.mxu1 %v208_v8  ;;  %v205_v13 = vld [vmem:[#allocation7 + $0xd8] sm:$0xff]  ;;  %v204_v15 = vld [vmem:[#allocation7 + $0xd0] sm:$0xff] }
  0x39   :  { %133 = vmatprep.subr.mxu0 %v84_v5  ;;  %v80_v14 = vld [vmem:[#allocation2] sm:$0xff]  ;;  %256 = vmatprep.subr.mxu1 %v207_v9  ;;  %v203_v16 = vld [vmem:[#allocation7 + $0xc8] sm:$0xff]  ;;  %v202_v17 = vld [vmem:[#allocation7 + $0xc0] sm:$0xff] }
  0x3a   :  { %134 = vmatpush1.msra.mxu0 %v83_v6  ;;  %257 = vmatpush1.msra.mxu1 %v206_v11  ;;  %v201_v18 = vld [vmem:[#allocation7 + $0xb8] sm:$0xff]  ;;  %v200_v19 = vld [vmem:[#allocation7 + $0xb0] sm:$0xff]  ;;  %v199_v20 = vld [vmem:[#allocation7 + $0xa8] sm:$0xff] }
  0x3b   :  { %135 = vmatprep.subr.mxu0 %v82_v10  ;;  %258 = vmatprep.subr.mxu1 %v205_v13  ;;  %v198_v21 = vld [vmem:[#allocation7 + $0xa0] sm:$0xff]  ;;  %v197_v22 = vld [vmem:[#allocation7 + $0x98] sm:$0xff]  ;;  %v196_v23 = vld [vmem:[#allocation7 + $0x90] sm:$0xff] }
  0x3c   :  { %136 = vmatpush1.msra.mxu0 %v81_v12  ;;  %259 = vmatpush1.msra.mxu1 %v204_v15  ;;  %v195_v24 = vld [vmem:[#allocation7 + $0x88] sm:$0xff]  ;;  %v194_v25 = vld [vmem:[#allocation7 + $0x80] sm:$0xff]  ;;  %v193_v26 = vld [vmem:[#allocation7 + $0x78] sm:$0xff] }
  0x3d   :  { %462 = vmatmul.mubr.msk.f32.vlgmr.msra.gmra.mxu0 %vm101_vm0, %v80_v14  ;;  %260 = vmatprep.subr.mxu1 %v203_v16  ;;  %v192_v27 = vld [vmem:[#allocation7 + $0x70] sm:$0xff]  ;;  %v191_v28 = vld [vmem:[#allocation7 + $0x68] sm:$0xff]  ;;  %v190_v29 = vld [vmem:[#allocation7 + $0x60] sm:$0xff] }
  0x3e   :  { %261 = vmatpush1.msra.mxu1 %v202_v17  ;;  %v189_v30 = vld [vmem:[#allocation7 + $0x58] sm:$0xff]  ;;  %v188_v31 = vld [vmem:[#allocation7 + $0x50] sm:$0xff]  ;;  %v187_v32 = vld [vmem:[#allocation7 + $0x48] sm:$0xff] }
  0x3f   :  { %262 = vmatprep.subr.mxu1 %v201_v18  ;;  %v186_v33 = vld [vmem:[#allocation7 + $0x40] sm:$0xff]  ;;  %v185_v34 = vld [vmem:[#allocation7 + $0x38] sm:$0xff]  ;;  %v184_v35 = vld [vmem:[#allocation7 + $0x30] sm:$0xff] }
  0x40   :  { %263 = vmatpush1.msra.mxu1 %v200_v19  ;;  %v183_v36 = vld [vmem:[#allocation7 + $0x28] sm:$0xff]  ;;  %v182_v37 = vld [vmem:[#allocation7 + $0x20] sm:$0xff]  ;;  %v181_v38 = vld [vmem:[#allocation7 + $0x18] sm:$0xff] }
  0x41   :  { %264 = vmatprep.subr.mxu1 %v199_v20  ;;  %v180_v39 = vld [vmem:[#allocation7 + $0x10] sm:$0xff]  ;;  %v179_v40 = vld [vmem:[#allocation7 + $0x8] sm:$0xff]  ;;  %v178_v41 = vld [vmem:[#allocation7] sm:$0xff] }
  0x42   :  { %265 = vmatpush1.msra.mxu1 %v198_v21  ;;  %v241_v42 = vld [vmem:[#allocation7 + $0x1f8] sm:$0xff]  ;;  %v240_v43 = vld [vmem:[#allocation7 + $0x1f0] sm:$0xff]  ;;  %v239_v44 = vld [vmem:[#allocation7 + $0x1e8] sm:$0xff] }
  0x43   :  { %266 = vmatprep.subr.mxu1 %v197_v22  ;;  %v238_v45 = vld [vmem:[#allocation7 + $0x1e0] sm:$0xff]  ;;  %v237_v46 = vld [vmem:[#allocation7 + $0x1d8] sm:$0xff]  ;;  %v236_v47 = vld [vmem:[#allocation7 + $0x1d0] sm:$0xff] }
  0x44   :  { %267 = vmatpush1.msra.mxu1 %v196_v23  ;;  %v235_v48 = vld [vmem:[#allocation7 + $0x1c8] sm:$0xff]  ;;  %v234_v49 = vld [vmem:[#allocation7 + $0x1c0] sm:$0xff]  ;;  %v233_v50 = vld [vmem:[#allocation7 + $0x1b8] sm:$0xff] }
  0x45   :  { %268 = vmatprep.subr.mxu1 %v195_v24  ;;  %v232_v51 = vld [vmem:[#allocation7 + $0x1b0] sm:$0xff]  ;;  %v231_v52 = vld [vmem:[#allocation7 + $0x1a8] sm:$0xff]  ;;  %v230_v53 = vld [vmem:[#allocation7 + $0x1a0] sm:$0xff] }
  0x46   :  { %269 = vmatpush1.msra.mxu1 %v194_v25  ;;  %v229_v54 = vld [vmem:[#allocation7 + $0x198] sm:$0xff]  ;;  %v228_v55 = vld [vmem:[#allocation7 + $0x190] sm:$0xff]  ;;  %v227_v56 = vld [vmem:[#allocation7 + $0x188] sm:$0xff] }
  0x47   :  { %270 = vmatprep.subr.mxu1 %v193_v26  ;;  %v226_v57 = vld [vmem:[#allocation7 + $0x180] sm:$0xff]  ;;  %v225_v58 = vld [vmem:[#allocation7 + $0x178] sm:$0xff]  ;;  %v224_v59 = vld [vmem:[#allocation7 + $0x170] sm:$0xff] }
  0x48   :  { %271 = vmatpush1.msra.mxu1 %v192_v27  ;;  %v223_v60 = vld [vmem:[#allocation7 + $0x168] sm:$0xff]  ;;  %v222_v61 = vld [vmem:[#allocation7 + $0x160] sm:$0xff]  ;;  %v221_v62 = vld [vmem:[#allocation7 + $0x158] sm:$0xff] }
  0x49   :  { %272 = vmatprep.subr.mxu1 %v191_v28  ;;  %v220_v63 = vld [vmem:[#allocation7 + $0x150] sm:$0xff]  ;;  %v219_v0 = vld [vmem:[#allocation7 + $0x148] sm:$0xff]  ;;  %v218_v1 = vld [vmem:[#allocation7 + $0x140] sm:$0xff] }
  0x4a   :  { %273 = vmatpush1.msra.mxu1 %v190_v29  ;;  %v217_v2 = vld [vmem:[#allocation7 + $0x138] sm:$0xff]  ;;  %v216_v3 = vld [vmem:[#allocation7 + $0x130] sm:$0xff]  ;;  %v215_v4 = vld [vmem:[#allocation7 + $0x128] sm:$0xff] }
  0x4b   :  { %274 = vmatprep.subr.mxu1 %v189_v30  ;;  %v214_v5 = vld [vmem:[#allocation7 + $0x120] sm:$0xff]  ;;  %v213_v6 = vld [vmem:[#allocation7 + $0x118] sm:$0xff]  ;;  %v212_v7 = vld [vmem:[#allocation7 + $0x110] sm:$0xff] }
  0x4c   :  { %275 = vmatpush1.msra.mxu1 %v188_v31  ;;  %v211_v8 = vld [vmem:[#allocation7 + $0x108] sm:$0xff]  ;;  %v210_v9 = vld [vmem:[#allocation7 + $0x100] sm:$0xff]  ;;  %v358_v10 = vld [vmem:[#allocation8 + $0xf8] sm:$0xff] }
  0x4d   :  { %276 = vmatprep.subr.mxu1 %v187_v32  ;;  %v342_v11 = vld [vmem:[#allocation8 + $0x78] sm:$0xff]  ;;  %v357_v12 = vld [vmem:[#allocation8 + $0xf0] sm:$0xff]  ;;  %464 = vmatprep.subr.mxu0 %v358_v10  ;;  %v356_v14 = vld [vmem:[#allocation8 + $0xe8] sm:$0xff] }
  0x4e   :  { %277 = vmatpush1.msra.mxu1 %v186_v33  ;;  %v341_v13 = vld [vmem:[#allocation8 + $0x70] sm:$0xff]  ;;  %465 = vmatpush3.msra.mxu0 %v342_v11  ;;  %v340_v15 = vld [vmem:[#allocation8 + $0x68] sm:$0xff]  ;;  %v355_v16 = vld [vmem:[#allocation8 + $0xe0] sm:$0xff] }
  0x4f   :  { %278 = vmatprep.subr.mxu1 %v185_v34  ;;  %466 = vmatprep.subr.mxu0 %v357_v12  ;;  %v339_v17 = vld [vmem:[#allocation8 + $0x60] sm:$0xff]  ;;  %v354_v18 = vld [vmem:[#allocation8 + $0xd8] sm:$0xff]  ;;  %v353_v20 = vld [vmem:[#allocation8 + $0xd0] sm:$0xff]  ;;  %v91_v34 = vlaneseq }
  0x50   :  { %279 = vmatpush1.msra.mxu1 %v184_v35  ;;  %467 = vmatpush3.msra.mxu0 %v341_v13  ;;  %v338_v19 = vld [vmem:[#allocation8 + $0x58] sm:$0xff]  ;;  %v337_v21 = vld [vmem:[#allocation8 + $0x50] sm:$0xff]  ;;  %v352_v22 = vld [vmem:[#allocation8 + $0xc8] sm:$0xff] }
  0x51   :  { %280 = vmatprep.subr.mxu1 %v183_v36  ;;  %468 = vmatprep.subr.mxu0 %v356_v14  ;;  %v336_v23 = vld [vmem:[#allocation8 + $0x48] sm:$0xff]  ;;  %v351_v24 = vld [vmem:[#allocation8 + $0xc0] sm:$0xff]  ;;  %v350_v26 = vld [vmem:[#allocation8 + $0xb8] sm:$0xff]  ;;  %v92_v35 = vshrl.u32 %v91_v34, 7 }
  0x52   :  { %281 = vmatpush1.msra.mxu1 %v182_v37  ;;  %469 = vmatpush3.msra.mxu0 %v340_v15  ;;  %v335_v25 = vld [vmem:[#allocation8 + $0x40] sm:$0xff]  ;;  %v334_v27 = vld [vmem:[#allocation8 + $0x38] sm:$0xff]  ;;  %v349_v28 = vld [vmem:[#allocation8 + $0xb0] sm:$0xff] }
  0x53   :  { %282 = vmatprep.subr.mxu1 %v181_v38  ;;  %470 = vmatprep.subr.mxu0 %v355_v16  ;;  %v333_v29 = vld [vmem:[#allocation8 + $0x30] sm:$0xff]  ;;  %v348_v30 = vld [vmem:[#allocation8 + $0xa8] sm:$0xff]  ;;  %v347_v32 = vld [vmem:[#allocation8 + $0xa0] sm:$0xff]  ;;  %v93_v36 = vsub.s32 0, %v92_v35  ;;  %v97_v38 = vsub.s32 1, %v92_v35 }
  0x54   :  { %283 = vmatpush1.msra.mxu1 %v180_v39  ;;  %471 = vmatpush3.msra.mxu0 %v339_v17  ;;  %v332_v31 = vld [vmem:[#allocation8 + $0x28] sm:$0xff]  ;;  %v331_v33 = vld [vmem:[#allocation8 + $0x20] sm:$0xff]  ;;  %v89_v37 = vld [vmem:[%s695_s2] sm:$0x3] }
  0x55   :  { %284 = vmatprep.subr.mxu1 %v179_v40  ;;  %472 = vmatprep.subr.mxu0 %v354_v18  ;;  %v94_v39 = vrot.slane %v89_v37, %v93_v36  ;;  %v98_v40 = vrot.slane %v89_v37, %v97_v38 }
  0x56   :  { %285 = vmatpush1.msra.mxu1 %v178_v41  ;;  %473 = vmatpush3.msra.mxu0 %v338_v19 }
  0x57   :  { %286 = vmatprep.subr.mxu1 %v241_v42  ;;  %474 = vmatprep.subr.mxu0 %v353_v20 }
  0x58   :  { %287 = vmatpush2.msra.mxu1 %v240_v43  ;;  %475 = vmatpush3.msra.mxu0 %v337_v21 }
  0x59   :  { %288 = vmatprep.subr.mxu1 %v239_v44  ;;  %476 = vmatprep.subr.mxu0 %v352_v22 }
  0x5a   :  { %289 = vmatpush2.msra.mxu1 %v238_v45  ;;  %477 = vmatpush3.msra.mxu0 %v336_v23 }
  0x5b   :  { %290 = vmatprep.subr.mxu1 %v237_v46  ;;  %478 = vmatprep.subr.mxu0 %v351_v24 }
  0x5c   :  { %291 = vmatpush2.msra.mxu1 %v236_v47  ;;  %479 = vmatpush3.msra.mxu0 %v335_v25  ;;  %v346_v47 = vld [vmem:[#allocation8 + $0x98] sm:$0xff] }
  0x5d   :  { %292 = vmatprep.subr.mxu1 %v235_v48  ;;  %480 = vmatprep.subr.mxu0 %v350_v26  ;;  %v330_v48 = vld [vmem:[#allocation8 + $0x18] sm:$0xff] }
  0x5e   :  { %293 = vmatpush2.msra.mxu1 %v234_v49  ;;  %481 = vmatpush3.msra.mxu0 %v334_v27  ;;  %v345_v49 = vld [vmem:[#allocation8 + $0x90] sm:$0xff] }
  0x5f   :  { %294 = vmatprep.subr.mxu1 %v233_v50  ;;  %482 = vmatprep.subr.mxu0 %v349_v28  ;;  %v329_v50 = vld [vmem:[#allocation8 + $0x10] sm:$0xff] }
  0x60   :  { %295 = vmatpush2.msra.mxu1 %v232_v51  ;;  %483 = vmatpush3.msra.mxu0 %v333_v29  ;;  %v344_v51 = vld [vmem:[#allocation8 + $0x88] sm:$0xff] }
  0x61   :  { %296 = vmatprep.subr.mxu1 %v231_v52  ;;  %484 = vmatprep.subr.mxu0 %v348_v30  ;;  %v328_v52 = vld [vmem:[#allocation8 + $0x8] sm:$0xff] }
  0x62   :  { %297 = vmatpush2.msra.mxu1 %v230_v53  ;;  %485 = vmatpush3.msra.mxu0 %v332_v31  ;;  %v343_v53 = vld [vmem:[#allocation8 + $0x80] sm:$0xff] }
  0x63   :  { %298 = vmatprep.subr.mxu1 %v229_v54  ;;  %486 = vmatprep.subr.mxu0 %v347_v32  ;;  %v327_v54 = vld [vmem:[#allocation8] sm:$0xff] }
  0x64   :  { %299 = vmatpush2.msra.mxu1 %v228_v55  ;;  %487 = vmatpush3.msra.mxu0 %v331_v33  ;;  %v242_v55 = vld [vmem:[%s697_s4] sm:$0x3]  ;;  %s628_s4 = smov [#allocation10]  }
  0x65   :  { %300 = vmatprep.subr.mxu1 %v227_v56  ;;  %488 = vmatprep.subr.mxu0 %v346_v47  ;;  %v247_v56 = vrot.slane %v242_v55, %v93_v36  ;;  %s451_s26 = sshll.u32 %s628_s4, 4  ;;  %s452_s26 = int_to_ptr.vmem [resolvable:$true] %s451_s26 }
  0x66   :  { %301 = vmatpush2.msra.mxu1 %v226_v57  ;;  %489 = vmatpush3.msra.mxu0 %v330_v48  ;;  %v251_v57 = vrot.slane %v242_v55, %v97_v38  ;;  %s591_s27 = scalar_lea.vmem %s452_s26, 128  ;;  %p596_p7 = scmp.lt.s32.totalorder %s452_s26, %s452_s26 }
  0x67   :  { %302 = vmatprep.subr.mxu1 %v225_v58  ;;  %490 = vmatprep.subr.mxu0 %v345_v49  ;;  %p592_p6 = scmp.ne.s32.totalorder %s452_s26, %s591_s27  ;;  %p597_p8 = scmp.lt.s32.totalorder %s591_s27, %s591_s27 }
  0x68   :  { %303 = vmatpush2.msra.mxu1 %v224_v59  ;;  %491 = vmatpush3.msra.mxu0 %v329_v50 }
  0x69   :  { %304 = vmatprep.subr.mxu1 %v223_v60  ;;  %492 = vmatprep.subr.mxu0 %v344_v51  ;;  %p598_p9 = por %p597_p8, %p596_p7 }
  0x6a   :  { %305 = vmatpush2.msra.mxu1 %v222_v61  ;;  %493 = vmatpush3.msra.mxu0 %v328_v52 }
  0x6b   :  { %306 = vmatprep.subr.mxu1 %v221_v62  ;;  %494 = vmatprep.subr.mxu0 %v343_v53  ;;  %p599_p10 = pnand %p598_p9, %p592_p6 }
  0x6c   :  { %307 = vmatpush2.msra.mxu1 %v220_v63  ;;  %495 = vmatpush3.msra.mxu0 %v327_v54 }
  0x6d   :  { %308 = vmatprep.subr.mxu1 %v219_v0 }
  0x6e   :  { %309 = vmatpush2.msra.mxu1 %v218_v1  ;;  %v463_v1 = vld [vmem:[%s699_s6] ss:$0 sm:$0xff] }
  0x6f   :  { %310 = vmatprep.subr.mxu1 %v217_v2 }
  0x70   :  { %311 = vmatpush2.msra.mxu1 %v216_v3 }
  0x71   :  { %312 = vmatprep.subr.mxu1 %v215_v4 }
  0x72   :  { %313 = vmatpush2.msra.mxu1 %v214_v5 }
  0x73   :  { %314 = vmatprep.subr.mxu1 %v213_v6 }
  0x74   :  { %315 = vmatpush2.msra.mxu1 %v212_v7 }
  0x75   :  { %316 = vmatprep.subr.mxu1 %v211_v8  ;;  %v437_v8 = vand.u32 127, %v91_v34 }
  0x76   :  { %317 = vmatpush2.msra.mxu1 %v210_v9 }
  0x77   :  { %vm442_vm1 = vcmp.lt.s32.totalorder %v437_v8, 8 }
  0xfd   :  { %v171_v41 = vpop.f32.mrf.mxu0 }
  0xfe   :  { %v172_v42 = vadd.f32 %v171_v41, %v94_v39 }
  0xff   :  { %v173_v43 = vpop.f32.mrf.mxu0 }
 0x100   :  { %v174_v44 = vadd.f32 %v173_v43, %v98_v40  ;;  %v176_v46 = vmax.f32 %v172_v42, 0.0 }
 0x102   :  { %v177_v45 = vmax.f32 %v174_v44, 0.0 }
 0x104   :  { %318 = vmatprep.mubr.f32.mxu1 %v177_v45 }
 0x105   :  { %319 = vmatmul.mubr.f32.vlgmr.msra.gmra.mxu1 %v176_v46 }
 0x1c5   :  { %v320_v58 = vpop.f32.mrf.mxu1 }
 0x1c6   :  { %v321_v59 = vadd.f32 %v320_v58, %v247_v56 }
 0x1c7   :  { %v322_v60 = vpop.f32.mrf.mxu1 }
 0x1c8   :  { %v323_v61 = vadd.f32 %v322_v60, %v251_v57  ;;  %v325_v63 = vmax.f32 %v321_v59, 0.0 }
 0x1ca   :  { %v326_v62 = vmax.f32 %v323_v61, 0.0 }
 0x1cc   :  { %430 = vmatprep.mubr.f32.mxu0 %v326_v62 }
 0x1cd   :  { %431 = vmatmul.mubr.f32.vlgmr.msra.gmra.mxu0 %v325_v63 }
 0x28d   :  { %v496_v0 = vpop.f32.mrf.mxu0 }
 0x28f   :  { %v497_v2 = vpop.f32.mrf.mxu0 }
 0x290   :  { %v498_v3 = vadd.f32 %v497_v2, %v496_v0 }
 0x292   :  { %v433_v4 = vadd.f32 %v498_v3, %v463_v1 }
 0x294   :  { %v438_v5 = vmax.f32 %v433_v4, -20.0 }
 0x296   :  { %v439_v6 = vmin.f32 %v438_v5, 2.0 }
 0x298   :  { %v440_v7 = vmul.f32 1.442695, %v439_v6 }
 0x29a   :  { %509 = vpow2.f32 %v440_v7 }
 0x2a7   :  { %v510_v9 = vpop.eup %509 }
 0x2a8   :  { %v443_v10 = vsel %vm442_vm1, %v433_v4, %v510_v9 }
 0x2a9   :  { %444 = vst [vmem:[#allocation10] sm:$0xff] %v443_v10 }
 0x2aa   :  { %602 = shalt.err (!%p599_p10)
}
 0x2ab   :  { %454 = dma.vmem_to_hbm [thread:$0]  %s452_s26, 128, %s700_s7, [#allocation4]  }
 0x2ac   :  { %617 = dma.done.wait [#allocation4], 128  }
 0x2ad   :  { %618 = vsyncadd [#allocation4], 4294967168 }
 0x2ae   :  { %458 = vsyncpa [#allocation3], 1 }
 0x2af   :  { %459 = vsyncpa [#allocation6], 1 }
 0x2b0   :  { %460 = vsyncpa [#allocation9], 1 }
 0x2b1   :  { %461 = vsyncpa [#allocation4], 1 }

</bundles_post_ra>
